<compile_context>
chip_gen: v7x
topology: tpu7x:2x2x1
jax: 0.10.0
libtpu: 0.0.40
codegen_flags: <defaults>
</compile_context>

<pallas_src>
import functools
import math

import jax
import jax.numpy as jnp
from jax.experimental import pallas as pl
from jax.experimental.pallas import tpu as pltpu

_NUM_CHUNKS = 4
# Whole-tensor-in-VMEM single-step path below this size (comfortably under the
# 32 MiB scoped-VMEM default on v7x, double-buffering included).
_SMALL_BYTES = 4 * 1024 * 1024
# Target per-block bytes for the tiled (large-input) path: ~0.5-2 MiB blocks
# reach ~85% of HBM roofline while leaving room for double buffering.
_TARGET_BLOCK_BYTES = 2 * 1024 * 1024


def _small_chunk_kernel(x_ref, o_ref, *, dim, cs):
    """Single grid step: whole tensor resident in VMEM; unrolled static slices
    split it into the 4 slots of the stacked output.  No HBM transposes, no
    per-chunk grid-step overhead."""
    ndim = len(x_ref.shape)
    for i in range(_NUM_CHUNKS):
        src = tuple(
            slice(i * cs, (i + 1) * cs) if ax == dim else slice(None)
            for ax in range(ndim)
        )
        o_ref[i] = x_ref[src]


def _tiled_chunk_kernel(x_ref, o_ref):
    """Chunk selection + within-chunk tiling are expressed in the BlockSpec
    index_maps; the body is a pure full-tile copy (the DMA engine does the
    slicing)."""
    o_ref[...] = x_ref[...]


def _pick_tile(shape, dim, itemsize, cs):
    """Pick an axis (not `dim`, not one of the last two dims -> sublane/lane
    stay full and dense) and a tile size so blocks are ~_TARGET_BLOCK_BYTES."""
    ndim = len(shape)
    chunk_shape = list(shape)
    chunk_shape[dim] = cs
    chunk_bytes = math.prod(chunk_shape) * itemsize
    candidates = [ax for ax in range(max(ndim - 2, 0)) if ax != dim]
    if not candidates or chunk_bytes <= _TARGET_BLOCK_BYTES:
        return None, None  # whole chunk per block
    tile_axis = candidates[0]
    n = chunk_shape[tile_axis]
    bytes_per_row = chunk_bytes // n
    best = 1
    for t in range(1, n + 1):
        if n % t == 0 and t * bytes_per_row <= _TARGET_BLOCK_BYTES:
            best = t
    return tile_axis, best


def chunk4(x, dim):
    """Equivalent of torch.chunk(x, chunks=4, dim=dim) when x.shape[dim] % 4 == 0."""
    ndim = x.ndim
    dim = dim % ndim
    c = x.shape[dim]
    # TODO(synk): torch.chunk allows a ragged final chunk; only even splits here.
    assert c % _NUM_CHUNKS == 0, "this synthetic kernel assumes an evenly divisible chunk dim"
    cs = c // _NUM_CHUNKS

    chunk_shape = tuple(cs if ax == dim else s for ax, s in enumerate(x.shape))
    out_shape = jax.ShapeDtypeStruct((_NUM_CHUNKS,) + chunk_shape, x.dtype)
    nbytes = x.size * x.dtype.itemsize

    if nbytes <= _SMALL_BYTES:
        # Small-tensor path: one grid step, whole tensor in VMEM.
        stacked = pl.pallas_call(
            functools.partial(_small_chunk_kernel, dim=dim, cs=cs),
            out_shape=out_shape,
        )(x)
    else:
        # Large-tensor path: chunk selection in the index_map on the original
        # layout, optionally tiled within the chunk to ~2 MiB blocks.
        # (If `dim` were one of the last two axes with an unaligned `cs`, the
        # block would not be (8,128)-aligned; test uses dim=1 so blocks keep
        # the full trailing dims -> dense, unmasked stores.)
        tile_axis, t = _pick_tile(x.shape, dim, x.dtype.itemsize, cs)

        in_block = list(x.shape)
        in_block[dim] = cs
        out_block = [None] + list(chunk_shape)  # leading chunk slot is squeezed

        if tile_axis is None:
            grid = (_NUM_CHUNKS,)

            def in_map(i):
                idx = [0] * ndim
                idx[dim] = i
                return tuple(idx)

            def out_map(i):
                idx = [0] * (ndim + 1)
                idx[0] = i
                return tuple(idx)

            semantics = ("parallel",)
        else:
            n_tiles = chunk_shape[tile_axis] // t
            in_block[tile_axis] = t
            out_block[1 + tile_axis] = t
            grid = (_NUM_CHUNKS, n_tiles)

            def in_map(i, j):
                idx = [0] * ndim
                idx[dim] = i
                idx[tile_axis] = j
                return tuple(idx)

            def out_map(i, j):
                idx = [0] * (ndim + 1)
                idx[0] = i
                idx[1 + tile_axis] = j
                return tuple(idx)

            semantics = ("parallel", "parallel")

        stacked = pl.pallas_call(
            _tiled_chunk_kernel,
            out_shape=out_shape,
            grid=grid,
            in_specs=[pl.BlockSpec(tuple(in_block), in_map)],
            out_specs=pl.BlockSpec(tuple(out_block), out_map),
            compiler_params=pltpu.CompilerParams(dimension_semantics=semantics),
        )(x)

    # Leading-axis slices of the stacked output: already in the original
    # layout, no transpose/reshape needed.
    return tuple(stacked[i] for i in range(_NUM_CHUNKS))


if __name__ == "__main__":
    key = jax.random.PRNGKey(0)
    # Small NCHW-style input, chunked along the channel dim (dim=1, 4 channels
    # -> 4 chunks of 1), matching the PyTorch test's small-shape regime.
    x = jax.random.normal(key, (2, 4, 16, 16), dtype=jnp.float32)
    dim = 1

    a, b, c, d = chunk4(x, dim)
    jax.block_until_ready((a, b, c, d))

    # Reference check against plain JAX split (mirrors torch.chunk semantics here).
    ra, rb, rc, rd = jnp.split(x, 4, axis=dim)
    assert a.shape == ra.shape and jnp.array_equal(a, ra)
    assert b.shape == rb.shape and jnp.array_equal(b, rb)
    assert c.shape == rc.shape and jnp.array_equal(c, rc)
    assert d.shape == rd.shape and jnp.array_equal(d, rd)

    print("KERNEL_OK")
</pallas_src>

<mosaic_0001>
module attributes {stable_mosaic.version = 11 : i64} {
  func.func @_small_chunk_kernel(%arg0: memref<2x4x16x16xf32, #tpu.memory_space<vmem>>, %arg1: memref<4x2x1x16x16xf32, #tpu.memory_space<vmem>>) attributes {dimension_semantics = [], scalar_prefetch = 0 : i64, scratch_operands = 0 : i64, tpu.core_type = #tpu.core_type<tc>} {
    %c0 = arith.constant 0 : index
    %c0_0 = arith.constant 0 : index
    %c0_1 = arith.constant 0 : index
    %c0_2 = arith.constant 0 : index
    %0 = vector.load %arg0[%c0, %c0_0, %c0_1, %c0_2] : memref<2x4x16x16xf32, #tpu.memory_space<vmem>>, vector<2x1x16x16xf32>
    %c0_3 = arith.constant 0 : index
    %c0_4 = arith.constant 0 : index
    %c0_5 = arith.constant 0 : index
    %c0_6 = arith.constant 0 : index
    %c0_7 = arith.constant 0 : index
    %1 = vector.load %arg1[%c0_3, %c0_4, %c0_5, %c0_6, %c0_7] : memref<4x2x1x16x16xf32, #tpu.memory_space<vmem>>, vector<1x2x1x16x16xf32>
    %2 = vector.shape_cast %1 : vector<1x2x1x16x16xf32> to vector<2x1x16x16xf32>
    %3 = vector.shape_cast %0 : vector<2x1x16x16xf32> to vector<1x2x1x16x16xf32>
    tpu.vector_store %arg1[%c0_3, %c0_4, %c0_5, %c0_6, %c0_7], %3 {strides = array<i32>} : memref<4x2x1x16x16xf32, #tpu.memory_space<vmem>>, vector<1x2x1x16x16xf32>,
    %c0_8 = arith.constant 0 : index
    %c1 = arith.constant 1 : index
    %c0_9 = arith.constant 0 : index
    %c0_10 = arith.constant 0 : index
    %4 = vector.load %arg0[%c0_8, %c1, %c0_9, %c0_10] : memref<2x4x16x16xf32, #tpu.memory_space<vmem>>, vector<2x1x16x16xf32>
    %c1_11 = arith.constant 1 : index
    %c0_12 = arith.constant 0 : index
    %c0_13 = arith.constant 0 : index
    %c0_14 = arith.constant 0 : index
    %c0_15 = arith.constant 0 : index
    %5 = vector.load %arg1[%c1_11, %c0_12, %c0_13, %c0_14, %c0_15] : memref<4x2x1x16x16xf32, #tpu.memory_space<vmem>>, vector<1x2x1x16x16xf32>
    %6 = vector.shape_cast %5 : vector<1x2x1x16x16xf32> to vector<2x1x16x16xf32>
    %7 = vector.shape_cast %4 : vector<2x1x16x16xf32> to vector<1x2x1x16x16xf32>
    tpu.vector_store %arg1[%c1_11, %c0_12, %c0_13, %c0_14, %c0_15], %7 {strides = array<i32>} : memref<4x2x1x16x16xf32, #tpu.memory_space<vmem>>, vector<1x2x1x16x16xf32>,
    %c0_16 = arith.constant 0 : index
    %c2 = arith.constant 2 : index
    %c0_17 = arith.constant 0 : index
    %c0_18 = arith.constant 0 : index
    %8 = vector.load %arg0[%c0_16, %c2, %c0_17, %c0_18] : memref<2x4x16x16xf32, #tpu.memory_space<vmem>>, vector<2x1x16x16xf32>
    %c2_19 = arith.constant 2 : index
    %c0_20 = arith.constant 0 : index
    %c0_21 = arith.constant 0 : index
    %c0_22 = arith.constant 0 : index
    %c0_23 = arith.constant 0 : index
    %9 = vector.load %arg1[%c2_19, %c0_20, %c0_21, %c0_22, %c0_23] : memref<4x2x1x16x16xf32, #tpu.memory_space<vmem>>, vector<1x2x1x16x16xf32>
    %10 = vector.shape_cast %9 : vector<1x2x1x16x16xf32> to vector<2x1x16x16xf32>
    %11 = vector.shape_cast %8 : vector<2x1x16x16xf32> to vector<1x2x1x16x16xf32>
    tpu.vector_store %arg1[%c2_19, %c0_20, %c0_21, %c0_22, %c0_23], %11 {strides = array<i32>} : memref<4x2x1x16x16xf32, #tpu.memory_space<vmem>>, vector<1x2x1x16x16xf32>,
    %c0_24 = arith.constant 0 : index
    %c3 = arith.constant 3 : index
    %c0_25 = arith.constant 0 : index
    %c0_26 = arith.constant 0 : index
    %12 = vector.load %arg0[%c0_24, %c3, %c0_25, %c0_26] : memref<2x4x16x16xf32, #tpu.memory_space<vmem>>, vector<2x1x16x16xf32>
    %c3_27 = arith.constant 3 : index
    %c0_28 = arith.constant 0 : index
    %c0_29 = arith.constant 0 : index
    %c0_30 = arith.constant 0 : index
    %c0_31 = arith.constant 0 : index
    %13 = vector.load %arg1[%c3_27, %c0_28, %c0_29, %c0_30, %c0_31] : memref<4x2x1x16x16xf32, #tpu.memory_space<vmem>>, vector<1x2x1x16x16xf32>
    %14 = vector.shape_cast %13 : vector<1x2x1x16x16xf32> to vector<2x1x16x16xf32>
    %15 = vector.shape_cast %12 : vector<2x1x16x16xf32> to vector<1x2x1x16x16xf32>
    tpu.vector_store %arg1[%c3_27, %c0_28, %c0_29, %c0_30, %c0_31], %15 {strides = array<i32>} : memref<4x2x1x16x16xf32, #tpu.memory_space<vmem>>, vector<1x2x1x16x16xf32>,
    return
  }
}

</mosaic_0001>

<bundles_post_ra>
// kernel: tpu_custom_call.1
= control target key start
LH: loop header
LB: loop body
LE: loop exit
PB: predicated region body
PF: predicated region fallthrough
CT: control target
= control target key end

     0   :  { %6 = vsyncpa [#allocation3], 0  ;;  %s191_s0 = inlined_call_operand.hbm [shape: f32[2,4,16,16], index: 0, kind: input, shape index: {}]   ;;  %s192_s1 = inlined_call_operand.hbm [shape: f32[4,2,1,16,16], index: 1, kind: output, shape index: {}]  }
   0x1   :  { %7 = vsyncpa [#allocation4], 0  ;;  %s131_s6 = smov [#allocation2]   ;;  %s83_s10 = scalar_lea.hbm %s191_s0, 2048 }
   0x2   :  { %s13_s7 = sshll.u32 %s131_s6, 4  ;;  %p84_p0 = scmp.ne.s32.totalorder %s191_s0, %s83_s10  ;;  %s14_s7 = int_to_ptr.vmem [resolvable:$true] %s13_s7 }
   0x3   :  { %p87_p1 = scmp.lt.u32.totalorder %s83_s10, %s191_s0 }
   0x5   :  { %p89_p2 = pnand %p87_p1, %p84_p0 }
   0x7   :  { %92 = shalt.err (!%p89_p2)
}
   0x8   :  { %s93_s15 = scalar_lea.vmem %s14_s7, 2048  ;;  %p98_p4 = scmp.lt.s32.totalorder %s14_s7, %s14_s7 }
   0x9   :  { %p94_p3 = scmp.ne.s32.totalorder %s14_s7, %s93_s15  ;;  %p99_p5 = scmp.lt.s32.totalorder %s93_s15, %s93_s15 }
   0xb   :  { %p100_p6 = por %p99_p5, %p98_p4 }
   0xd   :  { %p101_p7 = pnand %p100_p6, %p94_p3 }
   0xf   :  { %104 = shalt.err (!%p101_p7)
}
  0x10   :  { %s132_s16 = smov 128   ;;  %s133_s17 = smov 8  }
  0x11   :  { %19 = dma.hbm_to_vmem [thread:$0]  %s191_s0, 2048, %s14_s7, [#allocation3], %s132_s16, %s132_s16, %s133_s17  }
  0x12   :  { %127 = dma.done.wait [#allocation3], 2048  }
  0x13   :  { %128 = vsyncadd [#allocation3], 4294965248  ;;  %vm27_vm0 = vcmask 130048   ;;  %v23_v0 = vld [vmem:[#allocation2] sm:$0xff]  ;;  %v24_v1 = vld [vmem:[#allocation2 + $0x8] sm:$0xff]  ;;  %s134_s20 = smov [#allocation5]  }
  0x14   :  { %v25_v2 = vld [vmem:[#allocation2 + $0x40] sm:$0xff]  ;;  %28 = vst.msk [vmem:[#allocation5] sm:$0xff] %vm27_vm0, %v23_v0  ;;  %29 = vst.msk [vmem:[#allocation5 + $0x8] sm:$0xff] %vm27_vm0, %v24_v1  ;;  %v26_v3 = vld [vmem:[#allocation2 + $0x48] sm:$0xff]  ;;  %s67_s21 = sshll.u32 %s134_s20, 4  ;;  %s68_s21 = int_to_ptr.vmem [resolvable:$true] %s67_s21 }
  0x15   :  { %30 = vst.msk [vmem:[#allocation5 + $0x10] sm:$0xff] %vm27_vm0, %v25_v2  ;;  %v33_v4 = vld [vmem:[#allocation2 + $0x10] sm:$0xff]  ;;  %v34_v5 = vld [vmem:[#allocation2 + $0x18] sm:$0xff]  ;;  %31 = vst.msk [vmem:[#allocation5 + $0x18] sm:$0xff] %vm27_vm0, %v26_v3  ;;  %s105_s0 = scalar_lea.vmem %s68_s21, 2048  ;;  %p110_p9 = scmp.lt.s32.totalorder %s68_s21, %s68_s21 }
  0x16   :  { %38 = vst.msk [vmem:[#allocation5 + $0x20] sm:$0xff] %vm27_vm0, %v33_v4  ;;  %39 = vst.msk [vmem:[#allocation5 + $0x28] sm:$0xff] %vm27_vm0, %v34_v5  ;;  %v35_v6 = vld [vmem:[#allocation2 + $0x50] sm:$0xff]  ;;  %v36_v7 = vld [vmem:[#allocation2 + $0x58] sm:$0xff]  ;;  %p106_p8 = scmp.ne.s32.totalorder %s68_s21, %s105_s0  ;;  %p111_p10 = scmp.lt.s32.totalorder %s105_s0, %s105_s0 }
  0x17   :  { %v43_v8 = vld [vmem:[#allocation2 + $0x20] sm:$0xff]  ;;  %40 = vst.msk [vmem:[#allocation5 + $0x30] sm:$0xff] %vm27_vm0, %v35_v6  ;;  %41 = vst.msk [vmem:[#allocation5 + $0x38] sm:$0xff] %vm27_vm0, %v36_v7  ;;  %v44_v9 = vld [vmem:[#allocation2 + $0x28] sm:$0xff] }
  0x18   :  { %48 = vst.msk [vmem:[#allocation5 + $0x40] sm:$0xff] %vm27_vm0, %v43_v8  ;;  %v45_v10 = vld [vmem:[#allocation2 + $0x60] sm:$0xff]  ;;  %v46_v11 = vld [vmem:[#allocation2 + $0x68] sm:$0xff]  ;;  %49 = vst.msk [vmem:[#allocation5 + $0x48] sm:$0xff] %vm27_vm0, %v44_v9  ;;  %p112_p11 = por %p111_p10, %p110_p9 }
  0x19   :  { %50 = vst.msk [vmem:[#allocation5 + $0x50] sm:$0xff] %vm27_vm0, %v45_v10  ;;  %51 = vst.msk [vmem:[#allocation5 + $0x58] sm:$0xff] %vm27_vm0, %v46_v11  ;;  %v53_v12 = vld [vmem:[#allocation2 + $0x30] sm:$0xff]  ;;  %v54_v13 = vld [vmem:[#allocation2 + $0x38] sm:$0xff] }
  0x1a   :  { %v55_v14 = vld [vmem:[#allocation2 + $0x70] sm:$0xff]  ;;  %58 = vst.msk [vmem:[#allocation5 + $0x60] sm:$0xff] %vm27_vm0, %v53_v12  ;;  %59 = vst.msk [vmem:[#allocation5 + $0x68] sm:$0xff] %vm27_vm0, %v54_v13  ;;  %v56_v15 = vld [vmem:[#allocation2 + $0x78] sm:$0xff]  ;;  %p113_p12 = pnand %p112_p11, %p106_p8 }
  0x1b   :  { %60 = vst.msk [vmem:[#allocation5 + $0x70] sm:$0xff] %vm27_vm0, %v55_v14  ;;  %61 = vst.msk [vmem:[#allocation5 + $0x78] sm:$0xff] %vm27_vm0, %v56_v15 }
  0x1c   :  { %116 = shalt.err (!%p113_p12)
}
  0x1d   :  { %s117_s24 = scalar_lea.hbm %s192_s1, 2048 }
  0x1e   :  { %p118_p13 = scmp.ne.s32.totalorder %s192_s1, %s117_s24  ;;  %p121_p0 = scmp.lt.u32.totalorder %s117_s24, %s192_s1 }
  0x20   :  { %p123_p1 = pnand %p121_p0, %p118_p13 }
  0x22   :  { %126 = shalt.err (!%p123_p1)
}
  0x23   :  { %73 = dma.vmem_to_hbm [thread:$0]  %s68_s21, 2048, %s192_s1, [#allocation4], %s132_s16, %s132_s16, %s133_s17  }
  0x24   :  { %129 = dma.done.wait [#allocation4], 2048  }
  0x25   :  { %130 = vsyncadd [#allocation4], 4294965248 }
  0x26   :  { %77 = vsyncpa [#allocation3], 1 }
  0x27   :  { %78 = vsyncpa [#allocation4], 1 }

</bundles_post_ra>
